<compile_context>
chip_gen: v6e
topology: v6e:2x2x1
jax: 0.10.0
libtpu: 0.0.40
codegen_flags: <defaults>
</compile_context>

<pallas_src>
import jax
import jax.numpy as jnp
from jax.experimental import pallas as pl
from jax.experimental.pallas import tpu as pltpu

IN_FEATURES = 784
OUT_FEATURES = 10
OUT_PADDED = 128        # lane-dense MXU output width (multiple of 128)
MAX_TILE_N = 2048       # amortizes per-step overhead; fits 32 MiB scoped VMEM
VMEM_LIMIT_BYTES = 32 << 20


def _one_layer_kernel(x_ref, w_ref, b_ref, o_ref):
    """Fused linear + bias + sigmoid on one batch tile.

    x_ref: (TILE_N, 784)   input tile (native dtype; cast to bf16 for the MXU)
    w_ref: (784, 128)      bf16 transposed PyTorch weight, zero-padded cols 10..127
    b_ref: (1, 10)         f32 bias
    o_ref: (TILE_N, 10)    f32 output tile (narrow, contiguous in HBM)
    """
    # bf16 x bf16 -> f32 accumulation: MXU-native on v5e/v6e/v7x.
    z = jnp.dot(
        x_ref[...].astype(jnp.bfloat16),
        w_ref[...],
        preferred_element_type=jnp.float32,
    )
    # Drop the zero-padded MXU columns (same vreg footprint), add bias in f32.
    z = z[:, :OUT_FEATURES] + b_ref[...]
    # Sigmoid epilogue: exp + reciprocal land on the EUP slot.
    o_ref[...] = jax.nn.sigmoid(z).astype(o_ref.dtype)


def prepare_params(weight_t, bias):
    """One-time (hoisted) packing of parameters for the kernel.

    weight_t : (784, 10)  transpose of the PyTorch (10, 784) weight
    bias     : (10,)
    returns  : (w_pad bf16 (784, 128), b_row f32 (1, 10))
    """
    w_pad = (
        jnp.zeros((IN_FEATURES, OUT_PADDED), jnp.bfloat16)
        .at[:, :OUT_FEATURES]
        .set(weight_t.astype(jnp.bfloat16))
    )
    b_row = bias.astype(jnp.float32).reshape(1, OUT_FEATURES)
    return w_pad, b_row


def one_layer_forward(x, w_pad, b_row, *, tile_n=MAX_TILE_N):
    """Forward pass of OneLayer: sigmoid(x.view(-1, 784) @ W^T + b).

    x      : any shape whose trailing dims flatten to 784 (e.g. (N,1,28,28)),
             any float dtype (kept native in HBM; cast to bf16 on-chip).
    w_pad  : (784, 128) bf16 from prepare_params
    b_row  : (1, 10)    f32  from prepare_params
    returns: (N, 10) float32
    """
    x2d = x.reshape(-1, IN_FEATURES)
    n = x2d.shape[0]

    # Batch tile: multiple of 8 (sublane rule).  Cap at ~n/2 so that for
    # mid-size batches grid_n >= 2 and the "parallel" axis can be sharded
    # across both v7x TensorCores.
    two_way = 8 * pl.cdiv(n, 2 * 8)
    tile_n = max(8, min(tile_n, two_way))
    grid_n = pl.cdiv(n, tile_n)

    x_bytes = jnp.dtype(x2d.dtype).itemsize
    cost = pl.CostEstimate(
        flops=2 * n * IN_FEATURES * OUT_PADDED,
        transcendentals=2 * n * OUT_FEATURES,          # exp + reciprocal
        bytes_accessed=(
            n * IN_FEATURES * x_bytes                  # read x
            + IN_FEATURES * OUT_PADDED * 2             # read bf16 weight (resident)
            + OUT_FEATURES * 4                         # read bias
            + n * OUT_FEATURES * 4                     # write narrow output
        ),
    )

    out = pl.pallas_call(
        _one_layer_kernel,
        out_shape=jax.ShapeDtypeStruct((n, OUT_FEATURES), jnp.float32),
        grid_spec=pl.GridSpec(
            grid=(grid_n,),
            in_specs=[
                # x: tiled over the batch; last dim equals full array dim (784).
                pl.BlockSpec((tile_n, IN_FEATURES), lambda i: (i, 0)),
                # weight / bias: same block every step -> stay VMEM-resident.
                pl.BlockSpec((IN_FEATURES, OUT_PADDED), lambda i: (0, 0)),
                pl.BlockSpec((1, OUT_FEATURES), lambda i: (0, 0)),
            ],
            # Narrow output: last dim (10) equals the full array dim, masked
            # stores hide under the x DMA, and no post-kernel slice is needed.
            out_specs=pl.BlockSpec((tile_n, OUT_FEATURES), lambda i: (i, 0)),
        ),
        compiler_params=pltpu.CompilerParams(
            # Independent batch tiles: lets v7x shard across both TensorCores.
            dimension_semantics=("parallel",),
            vmem_limit_bytes=VMEM_LIMIT_BYTES,
        ),
        cost_estimate=cost,
    )(x2d, w_pad, b_row)

    return out


def init_params(key):
    """Deterministic init mimicking nn.Linear(784, 10) default init
    (uniform(-1/sqrt(fan_in), 1/sqrt(fan_in))). Weight stored transposed."""
    kw, kb = jax.random.split(key)
    bound = 1.0 / jnp.sqrt(jnp.float32(IN_FEATURES))
    weight_t = jax.random.uniform(
        kw, (IN_FEATURES, OUT_FEATURES), jnp.float32, -bound, bound
    )
    bias = jax.random.uniform(kb, (OUT_FEATURES,), jnp.float32, -bound, bound)
    return weight_t, bias


def _reference(x, weight_t, bias):
    return jax.nn.sigmoid(x.reshape(-1, IN_FEATURES) @ weight_t + bias)


if __name__ == "__main__":
    key = jax.random.PRNGKey(0)
    k_param, k_x1, k_x2 = jax.random.split(key, 3)

    weight_t, bias = init_params(k_param)
    w_pad, b_row = prepare_params(weight_t, bias)   # hoisted, one-time packing

    # Tolerance accounts for bf16 MXU operands (sigmoid compresses the error).
    ATOL, RTOL = 5e-3, 1e-2

    # 1) Small MNIST-like batch: (N, C, H, W) = (4, 1, 28, 28) -> 784 features.
    x = jax.random.normal(k_x1, (4, 1, 28, 28), jnp.float32)
    out = jax.block_until_ready(one_layer_forward(x, w_pad, b_row))
    ref = _reference(x, weight_t, bias)
    assert out.shape == (4, OUT_FEATURES)
    assert jnp.allclose(out, ref, atol=ATOL, rtol=RTOL), "mismatch (n=4)"

    # 2) Ragged batch (n not a multiple of 8 or of tile_n): exercises the
    #    last-tile OOB masking path.
    x2 = jax.random.normal(k_x2, (200, 784), jnp.float32)
    out2 = jax.block_until_ready(one_layer_forward(x2, w_pad, b_row))
    ref2 = _reference(x2, weight_t, bias)
    assert out2.shape == (200, OUT_FEATURES)
    assert jnp.allclose(out2, ref2, atol=ATOL, rtol=RTOL), "mismatch (n=200)"

    print("KERNEL_OK")
</pallas_src>

<mosaic_0001>
module attributes {stable_mosaic.version = 11 : i64} {
  func.func @_one_layer_kernel(%arg0: i32, %arg1: memref<8x784xf32, #tpu.memory_space<vmem>>, %arg2: memref<784x128xbf16, #tpu.memory_space<vmem>>, %arg3: memref<1x10xf32, #tpu.memory_space<vmem>>, %arg4: memref<8x10xf32, #tpu.memory_space<vmem>>) attributes {dimension_semantics = [#tpu.dimension_semantics<parallel>], iteration_bounds = array<i64: 1>, scalar_prefetch = 0 : i64, scratch_operands = 0 : i64, tpu.core_type = #tpu.core_type<tc>, window_params = [{transform_indices = @transform_0, window_bounds = array<i64: 8, 784>}, {pipeline_mode = #tpu.pipeline_mode<synchronous>, transform_indices = @transform_1, window_bounds = array<i64: 784, 128>}, {pipeline_mode = #tpu.pipeline_mode<synchronous>, transform_indices = @transform_2, window_bounds = array<i64: 1, 10>}, {transform_indices = @transform_3, window_bounds = array<i64: 8, 10>}]} {
    %c0 = arith.constant 0 : index
    %c0_0 = arith.constant 0 : index
    %0 = vector.load %arg1[%c0, %c0_0] : memref<8x784xf32, #tpu.memory_space<vmem>>, vector<8x784xf32>
    %1 = arith.truncf %0 : vector<8x784xf32> to vector<8x784xbf16>
    %c0_1 = arith.constant 0 : index
    %c0_2 = arith.constant 0 : index
    %2 = vector.load %arg2[%c0_1, %c0_2] : memref<784x128xbf16, #tpu.memory_space<vmem>>, vector<784x128xbf16>
    %cst = arith.constant dense<0.000000e+00> : vector<8x128xf32>
    %3 = tpu.matmul %1, %2, %cst {dimension_numbers = #tpu.dot_dimension_numbers<[1], [0], [0], [1], [0, 0, 1, 1], [], []>} : vector<8x784xbf16>, vector<784x128xbf16>, vector<8x128xf32> -> vector<8x128xf32>
    %4 = vector.extract_strided_slice %3 {offsets = [0, 0], sizes = [8, 10], strides = [1, 1]} : vector<8x128xf32> to vector<8x10xf32>
    %c0_3 = arith.constant 0 : index
    %c0_4 = arith.constant 0 : index
    %5 = vector.load %arg3[%c0_3, %c0_4] : memref<1x10xf32, #tpu.memory_space<vmem>>, vector<1x10xf32>
    %6 = vector.broadcast %5 : vector<1x10xf32> to vector<8x10xf32>
    %7 = arith.addf %4, %6 : vector<8x10xf32>
    %8 = arith.negf %7 : vector<8x10xf32>
    %9 = math.exp %8 : vector<8x10xf32>
    %cst_5 = arith.constant 1.000000e+00 : f32
    %10 = vector.broadcast %cst_5 : f32 to vector<8x10xf32>
    %11 = arith.addf %10, %9 : vector<8x10xf32>
    %12 = arith.divf %10, %11 : vector<8x10xf32>
    %c0_6 = arith.constant 0 : index
    %c0_7 = arith.constant 0 : index
    %13 = vector.load %arg4[%c0_6, %c0_7] : memref<8x10xf32, #tpu.memory_space<vmem>>, vector<8x10xf32>
    tpu.vector_store %arg4[%c0_6, %c0_7], %12 {strides = array<i32>} : memref<8x10xf32, #tpu.memory_space<vmem>>, vector<8x10xf32>,
    return
  }
  func.func @transform_0(%arg0: i32) -> (i32, i32) {
    %c0_i32 = arith.constant 0 : i32
    %c0_i32_0 = arith.constant 0 : i32
    return %arg0, %c0_i32 : i32, i32
  }
  func.func @transform_1(%arg0: i32) -> (i32, i32) {
    %c0_i32 = arith.constant 0 : i32
    %c0_i32_0 = arith.constant 0 : i32
    %c0_i32_1 = arith.constant 0 : i32
    return %c0_i32, %c0_i32_0 : i32, i32
  }
  func.func @transform_2(%arg0: i32) -> (i32, i32) {
    %c0_i32 = arith.constant 0 : i32
    %c0_i32_0 = arith.constant 0 : i32
    %c0_i32_1 = arith.constant 0 : i32
    return %c0_i32, %c0_i32_0 : i32, i32
  }
  func.func @transform_3(%arg0: i32) -> (i32, i32) {
    %c0_i32 = arith.constant 0 : i32
    %c0_i32_0 = arith.constant 0 : i32
    return %arg0, %c0_i32 : i32, i32
  }
}

</mosaic_0001>

<bundles_post_ra>
// kernel: tpu_custom_call.1
= control target key start
LH: loop header
LB: loop body
LE: loop exit
PB: predicated region body
PF: predicated region fallthrough
CT: control target
= control target key end

     0   :  { %8 = vsyncpa [#allocation3], 0  ;;  %s982_s0 = inlined_call_operand.hbm [shape: f32[4,784], index: 0, kind: input, shape index: {}]   ;;  %s983_s1 = inlined_call_operand.hbm [shape: bf16[784,128], index: 1, kind: input, shape index: {}]   ;;  %s984_s2 = inlined_call_operand.vmem [shape: f32[1,10], index: 2, kind: input, shape index: {}]   ;;  %s985_s3 = inlined_call_operand.hbm [shape: f32[4,10], index: 3, kind: output, shape index: {}]  }
   0x1   :  { %9 = vsyncpa [#allocation6], 0 }
   0x2   :  { %10 = vsyncpa [#allocation4], 0 }
   0x3   :  { %15 = vsyncadd [#allocation3], 448  ;;  %s935_s12 = smov [#allocation2]  }
   0x4   :  { %s16_s13 = sshll.u32 %s935_s12, 4  ;;  %s17_s13 = int_to_ptr.vmem [resolvable:$true] %s16_s13 }
   0x5   :  { %s877_s14 = scalar_lea.vmem %s17_s13, 448  ;;  %s881_s15 = scalar_lea.vmem %s17_s13, 896 }
   0x6   :  { %p878_p0 = scmp.ne.s32.totalorder %s17_s13, %s877_s14  ;;  %p882_p1 = scmp.lt.s32.totalorder %s17_s13, %s17_s13 }
   0x7   :  { %p883_p2 = scmp.lt.s32.totalorder %s881_s15, %s877_s14 }
   0x9   :  { %p884_p3 = por %p883_p2, %p882_p1 }
   0xb   :  { %p885_p4 = pnand %p884_p3, %p878_p0 }
   0xd   :  { %888 = shalt.err (!%p885_p4)
}
   0xe   :  { %s936_s16 = smov 448   ;;  %s937_s17 = smov 28  }
   0xf   :  { %22 = dma.hbm_to_vmem [thread:$0]  %s982_s0, 448, %s17_s13, [#allocation3], %s936_s16, %s936_s16, %s937_s17  }
  0x10   :  { %s938_s20 = smov [#allocation5]  }
  0x11   :  { %s28_s21 = sshll.u32 %s938_s20, 4  ;;  %s29_s21 = int_to_ptr.vmem [resolvable:$true] %s28_s21 }
  0x12   :  { %s897_s22 = scalar_lea.vmem %s29_s21, 6272  ;;  %p902_p6 = scmp.lt.s32.totalorder %s29_s21, %s29_s21 }
  0x13   :  { %p898_p5 = scmp.ne.s32.totalorder %s29_s21, %s897_s22  ;;  %p903_p7 = scmp.lt.s32.totalorder %s897_s22, %s897_s22 }
  0x15   :  { %p904_p8 = por %p903_p7, %p902_p6 }
  0x17   :  { %p905_p9 = pnand %p904_p8, %p898_p5 }
  0x19   :  { %908 = shalt.err (!%p905_p9)
}
  0x1a   :  { %s939_s23 = smov 64   ;;  %s940_s24 = smov 4  }
  0x1b   :  { %34 = dma.hbm_to_vmem [thread:$0]  %s983_s1, 6272, %s29_s21, [#allocation6], %s939_s23, %s939_s23, %s940_s24  }
  0x1c   :  { %929 = dma.done.wait [#allocation3], 896  }
  0x1d   :  { %930 = vsyncadd [#allocation3], 4294966400 }
  0x1e   :  { %931 = dma.done.wait [#allocation6], 6272  }
  0x1f   :  { %932 = vsyncadd [#allocation6], 4294961024  ;;  %v806_v0 = vld [vmem:[#allocation5 + $0x78] sm:$0xff]   ;;  %v810_v4 = vld [vmem:[#allocation5 + $0x70] sm:$0xff]   ;;  %v941_v37 = vmov 0.0   ;;  %vm942_vm0 = vmmov 0  }
  0x20   :  { %v807_v1 = vld [vmem:[#allocation5 + $0xf8] sm:$0xff]   ;;  %723 = vmatprep.subr.bf16.mxu0 %v806_v0  ;;  %v811_v5 = vld [vmem:[#allocation5 + $0xf0] sm:$0xff]   ;;  %v814_v8 = vld [vmem:[#allocation5 + $0x68] sm:$0xff]   ;;  %vm473_vm1 = vcmask 130048   ;;  %vm651_vm2 = vcmask 80896  }
  0x21   :  { %v808_v2 = vld [vmem:[#allocation5 + $0x38] sm:$0xff]   ;;  %745 = vmatprep.subr.bf16.mxu1 %v807_v1  ;;  %v812_v6 = vld [vmem:[#allocation5 + $0x30] sm:$0xff]   ;;  %v815_v9 = vld [vmem:[#allocation5 + $0xe8] sm:$0xff]  }
  0x22   :  { %v809_v3 = vld [vmem:[#allocation5 + $0xb8] sm:$0xff]   ;;  %724 = vmatpush3.bf16.msra.mxu0 %v808_v2  ;;  %v813_v7 = vld [vmem:[#allocation5 + $0xb0] sm:$0xff]   ;;  %v816_v10 = vld [vmem:[#allocation5 + $0x28] sm:$0xff]  }
  0x23   :  { %746 = vmatpush3.bf16.msra.mxu1 %v809_v3  ;;  %725 = vmatprep.subr.bf16.mxu0 %v810_v4  ;;  %v817_v11 = vld [vmem:[#allocation5 + $0xa8] sm:$0xff]   ;;  %v818_v12 = vld [vmem:[#allocation5 + $0x60] sm:$0xff]   ;;  %v822_v16 = vld [vmem:[#allocation5 + $0x58] sm:$0xff]  }
  0x24   :  { %747 = vmatprep.subr.bf16.mxu1 %v811_v5  ;;  %v819_v13 = vld [vmem:[#allocation5 + $0xe0] sm:$0xff]   ;;  %v823_v17 = vld [vmem:[#allocation5 + $0xd8] sm:$0xff]   ;;  %v826_v20 = vld [vmem:[#allocation5 + $0x50] sm:$0xff]  }
  0x25   :  { %v820_v14 = vld [vmem:[#allocation5 + $0x20] sm:$0xff]   ;;  %v824_v18 = vld [vmem:[#allocation5 + $0x18] sm:$0xff]   ;;  %v827_v21 = vld [vmem:[#allocation5 + $0xd0] sm:$0xff]  }
  0x26   :  { %726 = vmatpush3.bf16.msra.mxu0 %v812_v6  ;;  %v821_v15 = vld [vmem:[#allocation5 + $0xa0] sm:$0xff]   ;;  %v825_v19 = vld [vmem:[#allocation5 + $0x98] sm:$0xff]   ;;  %v828_v22 = vld [vmem:[#allocation5 + $0x10] sm:$0xff]  }
  0x27   :  { %748 = vmatpush3.bf16.msra.mxu1 %v813_v7  ;;  %727 = vmatprep.subr.bf16.mxu0 %v814_v8  ;;  %v829_v23 = vld [vmem:[#allocation5 + $0x90] sm:$0xff]   ;;  %v830_v24 = vld [vmem:[#allocation5 + $0x48] sm:$0xff]   ;;  %v834_v28 = vld [vmem:[#allocation5 + $0x40] sm:$0xff]  }
  0x28   :  { %749 = vmatprep.subr.bf16.mxu1 %v815_v9  ;;  %v831_v25 = vld [vmem:[#allocation5 + $0xc8] sm:$0xff]   ;;  %v835_v29 = vld [vmem:[#allocation5 + $0xc0] sm:$0xff]   ;;  %v843_v36 = vld [vmem:[#allocation2 + $0xc] ss:$28 sps:$4 sm:$0xff]  }
  0x29   :  { %v832_v26 = vld [vmem:[#allocation5 + $0x8] sm:$0xff]   ;;  %v836_v30 = vld [vmem:[#allocation5] sm:$0xff]   ;;  %v844_v39 = vld [vmem:[#allocation5 + $0x178] sm:$0xff]   ;;  %v77_v41 = vpack.c.bf16 %v843_v36, %v843_v36 }
  0x2a   :  { %728 = vmatpush3.bf16.msra.mxu0 %v816_v10  ;;  %v833_v27 = vld [vmem:[#allocation5 + $0x88] sm:$0xff]   ;;  %v837_v31 = vld [vmem:[#allocation5 + $0x80] sm:$0xff]   ;;  %v845_v42 = vld [vmem:[#allocation5 + $0x138] sm:$0xff]  }
  0x2b   :  { %750 = vmatpush3.bf16.msra.mxu1 %v817_v11  ;;  %729 = vmatprep.subr.bf16.mxu0 %v818_v12  ;;  %v838_v32 = vld [vmem:[#allocation2] ss:$28 sps:$4 sm:$0xff]   ;;  %v841_v35 = vld [vmem:[#allocation2 + $0x8] ss:$28 sps:$4 sm:$0xff]   ;;  %v852_v49 = vld [vmem:[#allocation5 + $0x158] sm:$0xff]  }
  0x2c   :  { %751 = vmatprep.subr.bf16.mxu1 %v819_v13  ;;  %v840_v33 = vld [vmem:[#allocation2 + $0x4] ss:$28 sps:$4 sm:$0xff]   ;;  %v74_v34 = vpack.c.bf16 %v838_v32, %v838_v32  ;;  %v76_v40 = vpack.c.bf16 %v841_v35, %v841_v35  ;;  %v846_v43 = vld [vmem:[#allocation5 + $0x170] sm:$0xff]   ;;  %549 = vmatprep.mubr.bf16.mxu1 %v77_v41  ;;  %v850_v47 = vld [vmem:[#allocation5 + $0x160] sm:$0xff]  }
  0x2d   :  { %v75_v38 = vpack.c.bf16 %v840_v33, %v840_v33  ;;  %v847_v44 = vld [vmem:[#allocation5 + $0x130] sm:$0xff]   ;;  %v848_v45 = vld [vmem:[#allocation5 + $0x168] sm:$0xff]   ;;  %v851_v48 = vld [vmem:[#allocation5 + $0x120] sm:$0xff]  }
  0x2e   :  { %730 = vmatpush3.bf16.msra.mxu0 %v820_v14  ;;  %v849_v46 = vld [vmem:[#allocation5 + $0x128] sm:$0xff]   ;;  %v853_v50 = vld [vmem:[#allocation5 + $0x118] sm:$0xff]   ;;  %v860_v51 = vld [vmem:[#allocation5 + $0x180] sm:$0xff]  }
  0x2f   :  { %752 = vmatpush3.bf16.msra.mxu1 %v821_v15  ;;  %731 = vmatprep.subr.bf16.mxu0 %v822_v16  ;;  %v854_v52 = vld [vmem:[#allocation5 + $0x150] sm:$0xff]   ;;  %v863_v53 = vld [vmem:[#allocation2 + $0x14] ss:$28 sps:$4 sm:$0xff]   ;;  %v856_v58 = vld [vmem:[#allocation5 + $0x148] sm:$0xff]  }
  0x30   :  { %753 = vmatprep.subr.bf16.mxu1 %v823_v17  ;;  %509 = vmatprep.mubr.bf16.mxu0 %v75_v38  ;;  %v864_v54 = vld [vmem:[#allocation2 + $0x18] ss:$28 sps:$4 sm:$0xff]   ;;  %v79_v55 = vpack.c.bf16 %v863_v53, %v863_v53  ;;  %v855_v56 = vld [vmem:[#allocation5 + $0x110] sm:$0xff]   ;;  %v857_v59 = vld [vmem:[#allocation5 + $0x108] sm:$0xff]  }
  0x31   :  { %v80_v57 = vpack.c.bf16 %v864_v54, %v864_v54  ;;  %v858_v60 = vld [vmem:[#allocation5 + $0x140] sm:$0xff]   ;;  %v861_v61 = vld [vmem:[#allocation2 + $0x10] ss:$28 sps:$4 sm:$0xff]  }
  0x32   :  { %732 = vmatpush3.bf16.msra.mxu0 %v824_v18  ;;  %v859_v62 = vld [vmem:[#allocation5 + $0x100] sm:$0xff]   ;;  %v78_v63 = vpack.c.bf16 %v861_v61, %v861_v61 }
  0x33   :  { %754 = vmatpush3.bf16.msra.mxu1 %v825_v19  ;;  %733 = vmatprep.subr.bf16.mxu0 %v826_v20  ;;  %v721_v20 = vld [vmem:[%s984_s2] ss:$0 sm:$0xff] }
  0x34   :  { %755 = vmatprep.subr.bf16.mxu1 %v827_v21 }
  0x36   :  { %734 = vmatpush3.bf16.msra.mxu0 %v828_v22 }
  0x37   :  { %756 = vmatpush3.bf16.msra.mxu1 %v829_v23  ;;  %735 = vmatprep.subr.bf16.mxu0 %v830_v24 }
  0x38   :  { %757 = vmatprep.subr.bf16.mxu1 %v831_v25 }
  0x3a   :  { %736 = vmatpush3.bf16.msra.mxu0 %v832_v26 }
  0x3b   :  { %758 = vmatpush3.bf16.msra.mxu1 %v833_v27  ;;  %737 = vmatprep.subr.bf16.mxu0 %v834_v28 }
  0x3c   :  { %759 = vmatprep.subr.bf16.mxu1 %v835_v29 }
  0x3e   :  { %738 = vmatpush3.bf16.msra.mxu0 %v836_v30 }
  0x3f   :  { %760 = vmatpush3.bf16.msra.mxu1 %v837_v31  ;;  %767 = vmatprep.subr.bf16.mxu0 %v844_v39 }
  0x40   :  { %791 = vmatprep.subr.bf16.mxu1 %v941_v37 }
  0x41   :  { %510 = vmatmul.mubr.bf16.vlgmr.msra.gmra.mxu0 %v74_v34 }
  0x42   :  { %550 = vmatmul.mubr.bf16.vlgmr.msra.gmra.mxu1 %v76_v40  ;;  %768 = vmatpush3.bf16.msra.mxu0 %v845_v42 }
  0x43   :  { %769 = vmatprep.subr.bf16.mxu0 %v846_v43  ;;  %793 = vmatprep.mubr.msk.bf16.mxu1 %vm942_vm0, %v941_v37 }
  0x44   :  { %792 = vmatpush3.bf16.msra.mxu1 %v860_v51  ;;  %589 = vmatprep.mubr.bf16.mxu0 %v79_v55 }
  0x46   :  { %770 = vmatpush3.bf16.msra.mxu0 %v847_v44 }
  0x47   :  { %771 = vmatprep.subr.bf16.mxu0 %v848_v45 }
  0x4a   :  { %772 = vmatpush3.bf16.msra.mxu0 %v849_v46  ;;  %794 = vmatmul.mubr.msk.bf16.vlgmr.msra.gmra.mxu1 %vm473_vm1, %v80_v57 }
  0x4b   :  { %773 = vmatprep.subr.bf16.mxu0 %v850_v47 }
  0x4e   :  { %774 = vmatpush3.bf16.msra.mxu0 %v851_v48 }
  0x4f   :  { %775 = vmatprep.subr.bf16.mxu0 %v852_v49 }
  0x52   :  { %776 = vmatpush3.bf16.msra.mxu0 %v853_v50 }
  0x53   :  { %777 = vmatprep.subr.bf16.mxu0 %v854_v52 }
  0x56   :  { %778 = vmatpush3.bf16.msra.mxu0 %v855_v56 }
  0x57   :  { %779 = vmatprep.subr.bf16.mxu0 %v856_v58 }
  0x5a   :  { %780 = vmatpush3.bf16.msra.mxu0 %v857_v59 }
  0x5b   :  { %781 = vmatprep.subr.bf16.mxu0 %v858_v60 }
  0x5e   :  { %782 = vmatpush3.bf16.msra.mxu0 %v859_v62 }
  0x61   :  { %590 = vmatmul.mubr.bf16.vlgmr.msra.gmra.mxu0 %v78_v63 }
 0x101   :  { %v739_v0 = vpop.f32.mrf.mxu0 }
 0x102   :  { %v761_v1 = vpop.f32.mrf.mxu1 }
 0x103   :  { %v740_v2 = vpop.f32.mrf.mxu0 }
 0x104   :  { %v762_v3 = vpop.f32.mrf.mxu1  ;;  %v741_v12 = vadd.f32 %v740_v2, %v739_v0 }
 0x105   :  { %v742_v4 = vpop.f32.mrf.mxu0  ;;  %v763_v13 = vadd.f32 %v762_v3, %v761_v1 }
 0x106   :  { %v764_v5 = vpop.f32.mrf.mxu1 }
 0x107   :  { %v743_v6 = vpop.f32.mrf.mxu0  ;;  %v552_v16 = vadd.f32 %v763_v13, %v741_v12 }
 0x108   :  { %v765_v7 = vpop.f32.mrf.mxu1 }
 0x10a   :  { %v631_v8 = vpop.f32.mrf.mxu1 }
 0x10c   :  { %v795_v9 = vpop.f32.mrf.mxu1 }
 0x10e   :  { %v634_v10 = vpop.f32.mrf.mxu1 }
 0x110   :  { %v796_v11 = vpop.f32.mrf.mxu1 }
 0x121   :  { %v783_v14 = vpop.f32.mrf.mxu0 }
 0x123   :  { %v784_v15 = vpop.f32.mrf.mxu0 }
 0x124   :  { %v785_v17 = vadd.f32 %v784_v15, %v783_v14 }
 0x125   :  { %v786_v18 = vpop.f32.mrf.mxu0 }
 0x126   :  { %v592_v19 = vadd.f32 %v785_v17, %v552_v16 }
 0x127   :  { %v787_v21 = vpop.f32.mrf.mxu0 }
 0x128   :  { %v632_v22 = vadd.f32 %v631_v8, %v592_v19 }
 0x12a   :  { %v644_v23 = vadd.f32 %v721_v20, %v632_v22 }
 0x12c   :  { %v722_v24 = vmul.f32 -1.442695, %v644_v23 }
 0x12e   :  { %865 = vpow2.f32 %v722_v24 }
 0x13b   :  { %v866_v25 = vpop.eup %865 }
 0x13c   :  { %v648_v26 = vadd.f32 1.0, %v866_v25 }
 0x13e   :  { %867 = vrcp.f32 %v648_v26 }
 0x14b   :  { %v868_v27 = vpop.eup %867 }
 0x14c   :  { %652 = vst.msk [vmem:[#allocation7] sm:$0xff] %vm651_vm2, %v868_v27 }
 0x14d   :  { %657 = vsyncadd [#allocation4], 64  ;;  %s943_s27 = smov [#allocation7]  }
 0x14e   :  { %s658_s28 = sshll.u32 %s943_s27, 4  ;;  %s659_s28 = int_to_ptr.vmem [resolvable:$true] %s658_s28 }
 0x14f   :  { %s909_s29 = scalar_lea.vmem %s659_s28, 64  ;;  %s913_s30 = scalar_lea.vmem %s659_s28, 128 }
 0x150   :  { %p910_p10 = scmp.ne.s32.totalorder %s659_s28, %s909_s29  ;;  %p914_p11 = scmp.lt.s32.totalorder %s659_s28, %s659_s28 }
 0x151   :  { %p915_p12 = scmp.lt.s32.totalorder %s913_s30, %s909_s29 }
 0x153   :  { %p916_p13 = por %p915_p12, %p914_p11 }
 0x155   :  { %p917_p0 = pnand %p916_p13, %p910_p10 }
 0x157   :  { %920 = shalt.err (!%p917_p0)
}
 0x158   :  { %664 = dma.vmem_to_hbm [thread:$0]  %s659_s28, 64, %s985_s3, [#allocation4], %s939_s23, %s939_s23, %s940_s24  }
 0x159   :  { %933 = dma.done.wait [#allocation4], 128  }
 0x15a   :  { %934 = vsyncadd [#allocation4], 4294967168 }
 0x15b   :  { %668 = vsyncpa [#allocation3], 1 }
 0x15c   :  { %669 = vsyncpa [#allocation6], 1 }
 0x15d   :  { %670 = vsyncpa [#allocation4], 1 }

</bundles_post_ra>
